<compile_context>
chip_gen: v6e
topology: v6e:2x2x1
jax: 0.10.0
libtpu: 0.0.40
codegen_flags: <defaults>
</compile_context>

<pallas_src>
import functools

import numpy as np
import jax
import jax.numpy as jnp
from jax.experimental import pallas as pl
from jax.experimental.pallas import tpu as pltpu


def _matching_kernel(src_ref, tgt_ref, g_ref, smask_ref, tmask_ref, conf_ref,
                     *, scale):
    """Dual-softmax matching over a block of bblk batches.

    src_ref:   (bblk, S, C)   raw source features
    tgt_ref:   (bblk, T, C)   raw target features
    g_ref:     (C, C)         Gram matrix W^T W, f32, resident across the grid
    smask_ref: (bblk, S)      float {0,1} source validity mask
    tmask_ref: (bblk, T)      float {0,1} target validity mask
    conf_ref:  (bblk, S*T)    float32 confidence output (lane-dense slab)
    """
    bb, s, _ = src_ref.shape
    t = tgt_ref.shape[1]

    src = src_ref[...]
    tgt = tgt_ref[...]
    g = g_ref[...]                                   # (C, C) f32

    # sim = (x W^T)(y W^T)^T / (C * temp) = x (W^T W) y^T * scale
    # Projection in f32 against the resident f32 Gram matrix (precision), then
    # cast proj down so the large batched matmul is native-dtype x native-dtype
    # with f32 accumulation (full bf16 MXU rate when features are bf16).
    proj = jnp.einsum('bsc,cd->bsd', src.astype(jnp.float32), g,
                      preferred_element_type=jnp.float32)
    sim = jnp.einsum('bsc,btc->bst', proj.astype(tgt.dtype), tgt,
                     preferred_element_type=jnp.float32) * scale

    sm = smask_ref[...][:, :, None] > 0.5            # (bblk, S, 1)
    tm = tmask_ref[...][:, None, :] > 0.5            # (bblk, 1, T)

    # Large finite negative: exp underflows to exactly 0 for masked entries
    # (identical to -inf when masks are non-degenerate); a fully-masked batch
    # gives a uniform factor instead of NaN (documented behavioral delta).
    neg = jnp.float32(-1e30)

    # softmax over S (dim=1 of [B,S,T]) with src-row masking
    sim1 = jnp.where(sm, sim, neg)
    m1 = jnp.max(sim1, axis=1, keepdims=True)
    e1 = jnp.exp(sim1 - m1)
    inv1 = 1.0 / jnp.sum(e1, axis=1, keepdims=True)  # (bblk, 1, T) tiny divide

    # softmax over T (dim=2 of [B,S,T]) with tgt-col masking
    sim2 = jnp.where(tm, sim, neg)
    m2 = jnp.max(sim2, axis=2, keepdims=True)
    e2 = jnp.exp(sim2 - m2)
    inv2 = 1.0 / jnp.sum(e2, axis=2, keepdims=True)  # (bblk, S, 1) tiny divide

    # Fused product: broadcast multiplies, no full-tile divides, no p1/p2 temps.
    conf = (e1 * inv1) * (e2 * inv2)
    # Lane-dense store: S*T-wide last dim avoids masked partial vst on T=16.
    conf_ref[...] = conf.reshape(bb, s * t).astype(conf_ref.dtype)


def _pick_batch_block(b, per_batch_bytes, budget_bytes):
    """Batches per grid step.

    Constraints: bblk divides B; bblk == B or bblk % 8 == 0 (so the 2-D
    (bblk, S)/(bblk, T)/(bblk, S*T) blocks satisfy the (8,128)/full-dim rule);
    the double-buffered footprint fits the VMEM budget; and when B is large,
    keep >= 2 grid steps so both v7x TensorCores get 'parallel' work.
    """
    cap = max(1, int(budget_bytes // max(1, per_batch_bytes)))
    candidates = []
    for bblk in range(1, b + 1):
        if b % bblk:
            continue
        if bblk != b and bblk % 8:
            continue
        if bblk > cap:
            continue
        candidates.append(bblk)
    if not candidates:
        # Nothing fits the budget under the divisibility constraint; fall back
        # to the smallest legal block and rely on vmem_limit headroom.
        for bblk in range(8, b, 8):
            if b % bblk == 0:
                return bblk
        return b
    multi = [c for c in candidates if b // c >= 2]
    if multi and b >= 16:          # v7x megacore: keep >= 2 parallel steps
        return max(multi)
    return max(candidates)


def subspace_matching_forward(src_feats, tgt_feats, src_mask, tgt_mask,
                              w_src, *, temperature, threshold):
    """Returns (conf_matrix [B,S,T] f32, match_mask [B,S,T] bool)."""
    B, S, C = src_feats.shape
    T = tgt_feats.shape[1]

    # nn.Linear(d, d, bias=False): y = x @ W.T (the original applies src_proj to
    # BOTH inputs).  Gram matrix G = W^T W so only one projection matmul runs
    # per step; kept in f32 (4 KB) to preserve precision on bf16 features.
    w32 = jnp.asarray(w_src, jnp.float32)
    g = jnp.dot(w32.T, w32)                          # (C, C) f32

    sm = src_mask.astype(jnp.float32)                # (B, S)
    tm = tgt_mask.astype(jnp.float32)                # (B, T)

    # feat/sqrt(C) on each side -> 1/C on the product, then /temperature.
    scale = 1.0 / (float(C) * float(temperature))
    kernel = functools.partial(_matching_kernel, scale=scale)

    # VMEM-budget-driven batch block: double-buffered in/out blocks plus an
    # estimate of the in-kernel f32 temporaries, against a ~24 MiB budget
    # (vmem_limit_bytes below is 32 MiB, portable across v5e/v6e/v7x).
    itemsize = jnp.dtype(src_feats.dtype).itemsize
    per_batch = 2 * ((S + T) * C * itemsize          # src + tgt blocks
                     + (S + T) * 4                   # masks (f32)
                     + S * T * 4)                    # conf output block (f32)
    per_batch += 6 * S * T * 4 + 2 * S * C * 4       # sim/e1/e2/conf/proj temps
    bblk = _pick_batch_block(B, per_batch, budget_bytes=24 * 1024 * 1024)
    grid = (B // bblk,)

    conf_flat = pl.pallas_call(
        kernel,
        out_shape=jax.ShapeDtypeStruct((B, S * T), jnp.float32),
        grid_spec=pltpu.PrefetchScalarGridSpec(
            num_scalar_prefetch=0,
            grid=grid,
            in_specs=[
                pl.BlockSpec((bblk, S, C), lambda i: (i, 0, 0)),
                pl.BlockSpec((bblk, T, C), lambda i: (i, 0, 0)),
                pl.BlockSpec((C, C), lambda i: (0, 0)),   # resident Gram matrix
                pl.BlockSpec((bblk, S), lambda i: (i, 0)),
                pl.BlockSpec((bblk, T), lambda i: (i, 0)),
            ],
            out_specs=pl.BlockSpec((bblk, S * T), lambda i: (i, 0)),
        ),
        compiler_params=pltpu.CompilerParams(
            dimension_semantics=("parallel",),       # shards batch blocks over TCs
            vmem_limit_bytes=32 * 1024 * 1024),
    )(src_feats, tgt_feats, g, sm, tm)

    conf = conf_flat.reshape(B, S, T)

    # get_match dense mask: threshold + mutual row/col argmax, computed in XLA
    # on the returned conf (removes the int8 output stream from the kernel).
    max_t = jnp.max(conf, axis=2, keepdims=True)     # torch dim=2
    max_s = jnp.max(conf, axis=1, keepdims=True)     # torch dim=1
    match_mask = (conf > threshold) & (conf == max_t) & (conf == max_s)
    return conf, match_mask


# ----------------------------------------------------------------------------
# Pure-JAX / numpy references for validation.
# ----------------------------------------------------------------------------
def reference_conf(src_feats, tgt_feats, src_mask, tgt_mask, w_src,
                   *, temperature):
    """Faithful port of the PyTorch dual_softmax confidence computation."""
    C = src_feats.shape[-1]
    ps = (src_feats @ w_src.T) / jnp.sqrt(jnp.float32(C))
    pt = (tgt_feats @ w_src.T) / jnp.sqrt(jnp.float32(C))
    sim = jnp.einsum('bsc,btc->bst', ps, pt) / temperature
    neg_inf = jnp.float32(-jnp.inf)
    sim1 = jnp.where(src_mask[:, :, None], sim, neg_inf)
    sim2 = jnp.where(tgt_mask[:, None, :], sim, neg_inf)
    return jax.nn.softmax(sim1, axis=1) * jax.nn.softmax(sim2, axis=2)


def get_match_mask(conf, thr):
    """numpy port of SubspaceMatchingV2.get_match's dense mask."""
    conf = np.asarray(conf)
    mask = conf > thr
    mask &= conf == conf.max(axis=2, keepdims=True)
    mask &= conf == conf.max(axis=1, keepdims=True)
    return mask


if __name__ == "__main__":
    # config: match_type='dual_softmax', feature_dim=32,
    #         dsmax_temperature=0.1, confidence_threshold=0.2
    B, S, T, C = 2, 16, 16, 32
    temperature = 0.1
    threshold = 0.2

    key = jax.random.PRNGKey(0)
    k1, k2, k3 = jax.random.split(key, 3)
    src_feats = jax.random.normal(k1, (B, S, C), jnp.float32)
    tgt_feats = jax.random.normal(k2, (B, T, C), jnp.float32)
    # src_proj weight (tgt_proj is created but unused in the original forward).
    w_src = jax.random.normal(k3, (C, C), jnp.float32) / jnp.sqrt(jnp.float32(C))

    src_mask = jnp.arange(S)[None, :] < jnp.array([12, 16])[:, None]
    tgt_mask = jnp.arange(T)[None, :] < jnp.array([10, 16])[:, None]

    # TODO(synk): src_mask[valid_matching_mask] is a dynamic boolean batch
    # selection with no static-shape JAX equivalent; all-True here => identity.
    valid_matching_mask = jnp.array([True, True])

    conf, match_mask = subspace_matching_forward(
        src_feats, tgt_feats, src_mask, tgt_mask, w_src,
        temperature=temperature, threshold=threshold)
    conf = jax.block_until_ready(conf)
    match_mask = jax.block_until_ready(match_mask)

    # TODO(synk): torch.nonzero (coarse_match) has dynamic output length; done
    # on host.
    coarse_match = np.argwhere(np.asarray(match_mask))

    # 1) confidence matches the faithful reference (Gram-matrix refactor only
    #    perturbs fp32 rounding order, so a small rtol suffices).
    conf_ref = reference_conf(src_feats, tgt_feats, src_mask, tgt_mask, w_src,
                              temperature=temperature)
    np.testing.assert_allclose(np.asarray(conf), np.asarray(conf_ref),
                               rtol=5e-4, atol=1e-6)
    # 2) the match logic is bit-exact w.r.t. the kernel's conf.
    assert np.array_equal(np.asarray(match_mask),
                          get_match_mask(conf, threshold))
    assert coarse_match.shape[1] == 3

    print("KERNEL_OK")
</pallas_src>

<mosaic_0001>
module attributes {stable_mosaic.version = 11 : i64} {
  func.func @_matching_kernel(%arg0: i32, %arg1: memref<2x16x32xf32, #tpu.memory_space<vmem>>, %arg2: memref<2x16x32xf32, #tpu.memory_space<vmem>>, %arg3: memref<32x32xf32, #tpu.memory_space<vmem>>, %arg4: memref<2x16xf32, #tpu.memory_space<vmem>>, %arg5: memref<2x16xf32, #tpu.memory_space<vmem>>, %arg6: memref<2x256xf32, #tpu.memory_space<vmem>>) attributes {dimension_semantics = [#tpu.dimension_semantics<parallel>], iteration_bounds = array<i64: 1>, scalar_prefetch = 0 : i64, scratch_operands = 0 : i64, tpu.core_type = #tpu.core_type<tc>, window_params = [{transform_indices = @transform_0, window_bounds = array<i64: 2, 16, 32>}, {transform_indices = @transform_1, window_bounds = array<i64: 2, 16, 32>}, {pipeline_mode = #tpu.pipeline_mode<synchronous>, transform_indices = @transform_2, window_bounds = array<i64: 32, 32>}, {transform_indices = @transform_3, window_bounds = array<i64: 2, 16>}, {transform_indices = @transform_4, window_bounds = array<i64: 2, 16>}, {transform_indices = @transform_5, window_bounds = array<i64: 2, 256>}]} {
    %c0 = arith.constant 0 : index
    %c0_0 = arith.constant 0 : index
    %c0_1 = arith.constant 0 : index
    %0 = vector.load %arg1[%c0, %c0_0, %c0_1] : memref<2x16x32xf32, #tpu.memory_space<vmem>>, vector<2x16x32xf32>
    %c0_2 = arith.constant 0 : index
    %c0_3 = arith.constant 0 : index
    %c0_4 = arith.constant 0 : index
    %1 = vector.load %arg2[%c0_2, %c0_3, %c0_4] : memref<2x16x32xf32, #tpu.memory_space<vmem>>, vector<2x16x32xf32>
    %c0_5 = arith.constant 0 : index
    %c0_6 = arith.constant 0 : index
    %2 = vector.load %arg3[%c0_5, %c0_6] : memref<32x32xf32, #tpu.memory_space<vmem>>, vector<32x32xf32>
    "tpu.trace_start"() <{level = 10 : i32, message = "bsc,cd->bsd"}> : () -> ()
    %cst = arith.constant dense<0.000000e+00> : vector<2x16x32xf32>
    %3 = tpu.matmul %0, %2, %cst {dimension_numbers = #tpu.dot_dimension_numbers<[2], [0], [0, 1], [1], [0, 0, 0, 1, 1, 1], [], []>} : vector<2x16x32xf32>, vector<32x32xf32>, vector<2x16x32xf32> -> vector<2x16x32xf32>
    "tpu.trace_stop"() : () -> ()
    "tpu.trace_start"() <{level = 10 : i32, message = "bsc,btc->bst"}> : () -> ()
    %cst_7 = arith.constant dense<0.000000e+00> : vector<2x16x16xf32>
    %4 = tpu.matmul %3, %1, %cst_7 {dimension_numbers = #tpu.dot_dimension_numbers<[2], [2], [1], [1], [0, 0, 0, 1, 1, 1], [0], [0]>} : vector<2x16x32xf32>, vector<2x16x32xf32>, vector<2x16x16xf32> -> vector<2x16x16xf32>
    "tpu.trace_stop"() : () -> ()
    %cst_8 = arith.constant 3.125000e-01 : f32
    %5 = vector.broadcast %cst_8 : f32 to vector<2x16x16xf32>
    %6 = arith.mulf %4, %5 : vector<2x16x16xf32>
    %c0_9 = arith.constant 0 : index
    %c0_10 = arith.constant 0 : index
    %7 = vector.load %arg4[%c0_9, %c0_10] : memref<2x16xf32, #tpu.memory_space<vmem>>, vector<2x16xf32>
    %8 = vector.shape_cast %7 : vector<2x16xf32> to vector<2x16x1xf32>
    %cst_11 = arith.constant 5.000000e-01 : f32
    %9 = vector.broadcast %cst_11 : f32 to vector<2x16x1xf32>
    %10 = arith.cmpf ogt, %8, %9 : vector<2x16x1xf32>
    %c0_12 = arith.constant 0 : index
    %c0_13 = arith.constant 0 : index
    %11 = vector.load %arg5[%c0_12, %c0_13] : memref<2x16xf32, #tpu.memory_space<vmem>>, vector<2x16xf32>
    %12 = vector.shape_cast %11 : vector<2x16xf32> to vector<2x1x16xf32>
    %cst_14 = arith.constant 5.000000e-01 : f32
    %13 = vector.broadcast %cst_14 : f32 to vector<2x1x16xf32>
    %14 = arith.cmpf ogt, %12, %13 : vector<2x1x16xf32>
    %cst_15 = arith.constant -1.000000e+30 : f32
    %15 = vector.shape_cast %10 : vector<2x16x1xi1> to vector<2x16x1xi1>
    %16 = vector.broadcast %15 : vector<2x16x1xi1> to vector<2x16x16xi1>
    %17 = vector.broadcast %cst_15 : f32 to vector<2x16x16xf32>
    %18 = arith.select %16, %6, %17 : vector<2x16x16xi1>, vector<2x16x16xf32>
    %cst_16 = arith.constant dense<0xFF800000> : vector<2x16xf32>
    %19 = vector.multi_reduction <maximumf>, %18, %cst_16 [1] : vector<2x16x16xf32> to vector<2x16xf32>
    %20 = vector.shape_cast %19 : vector<2x16xf32> to vector<2x1x16xf32>
    %21 = vector.broadcast %20 : vector<2x1x16xf32> to vector<2x16x16xf32>
    %22 = arith.subf %18, %21 : vector<2x16x16xf32>
    %23 = math.exp %22 : vector<2x16x16xf32>
    %cst_17 = arith.constant dense<0.000000e+00> : vector<2x16xf32>
    %24 = vector.multi_reduction <add>, %23, %cst_17 [1] : vector<2x16x16xf32> to vector<2x16xf32>
    %25 = vector.shape_cast %24 : vector<2x16xf32> to vector<2x1x16xf32>
    %cst_18 = arith.constant 1.000000e+00 : f32
    %26 = vector.broadcast %cst_18 : f32 to vector<2x1x16xf32>
    %27 = arith.divf %26, %25 : vector<2x1x16xf32>
    %cst_19 = arith.constant -1.000000e+30 : f32
    %28 = vector.shape_cast %14 : vector<2x1x16xi1> to vector<2x1x16xi1>
    %29 = vector.broadcast %28 : vector<2x1x16xi1> to vector<2x16x16xi1>
    %30 = vector.broadcast %cst_19 : f32 to vector<2x16x16xf32>
    %31 = arith.select %29, %6, %30 : vector<2x16x16xi1>, vector<2x16x16xf32>
    %cst_20 = arith.constant dense<0xFF800000> : vector<2x16xf32>
    %32 = vector.multi_reduction <maximumf>, %31, %cst_20 [2] : vector<2x16x16xf32> to vector<2x16xf32>
    %33 = vector.shape_cast %32 : vector<2x16xf32> to vector<2x16x1xf32>
    %34 = vector.broadcast %33 : vector<2x16x1xf32> to vector<2x16x16xf32>
    %35 = arith.subf %31, %34 : vector<2x16x16xf32>
    %36 = math.exp %35 : vector<2x16x16xf32>
    %cst_21 = arith.constant dense<0.000000e+00> : vector<2x16xf32>
    %37 = vector.multi_reduction <add>, %36, %cst_21 [2] : vector<2x16x16xf32> to vector<2x16xf32>
    %38 = vector.shape_cast %37 : vector<2x16xf32> to vector<2x16x1xf32>
    %cst_22 = arith.constant 1.000000e+00 : f32
    %39 = vector.broadcast %cst_22 : f32 to vector<2x16x1xf32>
    %40 = arith.divf %39, %38 : vector<2x16x1xf32>
    %41 = vector.broadcast %27 : vector<2x1x16xf32> to vector<2x16x16xf32>
    %42 = arith.mulf %23, %41 : vector<2x16x16xf32>
    %43 = vector.broadcast %40 : vector<2x16x1xf32> to vector<2x16x16xf32>
    %44 = arith.mulf %36, %43 : vector<2x16x16xf32>
    %45 = arith.mulf %42, %44 : vector<2x16x16xf32>
    %46 = vector.shape_cast %45 : vector<2x16x16xf32> to vector<2x256xf32>
    %c0_23 = arith.constant 0 : index
    %c0_24 = arith.constant 0 : index
    %47 = vector.load %arg6[%c0_23, %c0_24] : memref<2x256xf32, #tpu.memory_space<vmem>>, vector<2x256xf32>
    tpu.vector_store %arg6[%c0_23, %c0_24], %46 {strides = array<i32>} : memref<2x256xf32, #tpu.memory_space<vmem>>, vector<2x256xf32>,
    return
  }
  func.func @transform_0(%arg0: i32) -> (i32, i32, i32) {
    %c0_i32 = arith.constant 0 : i32
    %c0_i32_0 = arith.constant 0 : i32
    %c0_i32_1 = arith.constant 0 : i32
    return %arg0, %c0_i32, %c0_i32_0 : i32, i32, i32
  }
  func.func @transform_1(%arg0: i32) -> (i32, i32, i32) {
    %c0_i32 = arith.constant 0 : i32
    %c0_i32_0 = arith.constant 0 : i32
    %c0_i32_1 = arith.constant 0 : i32
    return %arg0, %c0_i32, %c0_i32_0 : i32, i32, i32
  }
  func.func @transform_2(%arg0: i32) -> (i32, i32) {
    %c0_i32 = arith.constant 0 : i32
    %c0_i32_0 = arith.constant 0 : i32
    %c0_i32_1 = arith.constant 0 : i32
    return %c0_i32, %c0_i32_0 : i32, i32
  }
  func.func @transform_3(%arg0: i32) -> (i32, i32) {
    %c0_i32 = arith.constant 0 : i32
    %c0_i32_0 = arith.constant 0 : i32
    return %arg0, %c0_i32 : i32, i32
  }
  func.func @transform_4(%arg0: i32) -> (i32, i32) {
    %c0_i32 = arith.constant 0 : i32
    %c0_i32_0 = arith.constant 0 : i32
    return %arg0, %c0_i32 : i32, i32
  }
  func.func @transform_5(%arg0: i32) -> (i32, i32) {
    %c0_i32 = arith.constant 0 : i32
    %c0_i32_0 = arith.constant 0 : i32
    return %arg0, %c0_i32 : i32, i32
  }
}

</mosaic_0001>

<bundles_post_ra>
// kernel: tpu_custom_call.1
= control target key start
LH: loop header
LB: loop body
LE: loop exit
PB: predicated region body
PF: predicated region fallthrough
CT: control target
= control target key end

     0   :  { %10 = vsyncpa [#allocation3], 0  ;;  %s1100_s0 = inlined_call_operand.hbm [shape: f32[2,16,32], index: 0, kind: input, shape index: {}]   ;;  %s1101_s1 = inlined_call_operand.hbm [shape: f32[2,16,32], index: 1, kind: input, shape index: {}]   ;;  %s1102_s2 = inlined_call_operand.hbm [shape: f32[32,32], index: 2, kind: input, shape index: {}]   ;;  %s1103_s3 = inlined_call_operand.vmem [shape: f32[2,16], index: 3, kind: input, shape index: {}]   ;;  %s1104_s4 = inlined_call_operand.vmem [shape: f32[2,16], index: 4, kind: input, shape index: {}]   ;;  %s1105_s5 = inlined_call_operand.hbm [shape: f32[2,256], index: 5, kind: output, shape index: {}]  }
   0x1   :  { %11 = vsyncpa [#allocation6], 0 }
   0x2   :  { %12 = vsyncpa [#allocation4], 0  ;;  %s967_s18 = smov [#allocation5]   ;;  %s968_s20 = smov [#allocation2]  }
   0x3   :  { %s30_s19 = sshll.u32 %s967_s18, 4  ;;  %s18_s21 = sshll.u32 %s968_s20, 4  ;;  %s31_s19 = int_to_ptr.vmem [resolvable:$true] %s30_s19  ;;  %s19_s21 = int_to_ptr.vmem [resolvable:$true] %s18_s21 }
   0x4   :  { %s889_s22 = scalar_lea.vmem %s31_s19, 512  ;;  %p894_p1 = scmp.lt.s32.totalorder %s31_s19, %s31_s19 }
   0x5   :  { %p890_p0 = scmp.ne.s32.totalorder %s31_s19, %s889_s22  ;;  %p895_p2 = scmp.lt.s32.totalorder %s889_s22, %s889_s22 }
   0x7   :  { %p896_p3 = por %p895_p2, %p894_p1 }
   0x9   :  { %p897_p4 = pnand %p896_p3, %p890_p0 }
   0xb   :  { %900 = shalt.err (!%p897_p4)
}
   0xc   :  { %s969_s23 = smov 128   ;;  %s970_s24 = smov 8  }
   0xd   :  { %36 = dma.hbm_to_vmem [thread:$0]  %s1101_s1, 512, %s31_s19, [#allocation6], %s969_s23, %s969_s23, %s970_s24  }
   0xe   :  { %s909_s27 = scalar_lea.vmem %s19_s21, 512  ;;  %p914_p6 = scmp.lt.s32.totalorder %s19_s21, %s19_s21 }
   0xf   :  { %p910_p5 = scmp.ne.s32.totalorder %s19_s21, %s909_s27  ;;  %p915_p7 = scmp.lt.s32.totalorder %s909_s27, %s909_s27 }
  0x11   :  { %p916_p8 = por %p915_p7, %p914_p6 }
  0x13   :  { %p917_p9 = pnand %p916_p8, %p910_p5 }
  0x15   :  { %920 = shalt.err (!%p917_p9)
}
  0x16   :  { %24 = dma.hbm_to_vmem [thread:$0]  %s1100_s0, 512, %s19_s21, [#allocation3], %s969_s23, %s969_s23, %s970_s24  }
  0x17   :  { %s971_s30 = smov [#allocation7]  }
  0x18   :  { %s42_s6 = sshll.u32 %s971_s30, 4  ;;  %s43_s6 = int_to_ptr.vmem [resolvable:$true] %s42_s6 }
  0x19   :  { %s929_s7 = scalar_lea.vmem %s43_s6, 512  ;;  %p934_p11 = scmp.lt.s32.totalorder %s43_s6, %s43_s6 }
  0x1a   :  { %p930_p10 = scmp.ne.s32.totalorder %s43_s6, %s929_s7  ;;  %p935_p12 = scmp.lt.s32.totalorder %s929_s7, %s929_s7 }
  0x1c   :  { %p936_p13 = por %p935_p12, %p934_p11 }
  0x1e   :  { %p937_p0 = pnand %p936_p13, %p930_p10 }
  0x20   :  { %940 = shalt.err (!%p937_p0)
}
  0x21   :  { %48 = dma.hbm_to_vmem [thread:$0]  %s1102_s2, 512, %s43_s6, [#allocation6], %s969_s23, %s969_s23, %s970_s24  }
  0x22   :  { %961 = dma.done.wait [#allocation3], 512  }
  0x23   :  { %962 = vsyncadd [#allocation3], 4294966784 }
  0x24   :  { %963 = dma.done.wait [#allocation6], 1024  }
  0x25   :  { %964 = vsyncadd [#allocation6], 4294966272  ;;  %vm74_vm0 = vcmask 261120   ;;  %v73_v0 = vld [vmem:[#allocation7 + $0x18] sm:$0xff]  ;;  %v72_v1 = vld [vmem:[#allocation7 + $0x10] sm:$0xff]  ;;  %v351_v16 = vlaneseq  ;;  %v973_v27 = vmov 0  }
  0x26   :  { %807 = vmatprep.subr.mxu0 %v73_v0  ;;  %v62_v2 = vld [vmem:[#allocation2] sm:$0xff]  ;;  %v71_v3 = vld [vmem:[#allocation7 + $0x8] sm:$0xff]  ;;  %v69_v7 = vld [vmem:[#allocation5 + $0x18] sm:$0xff]  ;;  %v972_v17 = vmov 1966171168   ;;  %vm417_vm4 = vcmask 130048  }
  0x27   :  { %808 = vmatpush3.msra.mxu0 %v73_v0  ;;  %815 = vmatprep.mubr.msk.f32.mxu0 %vm74_vm0, %v62_v2  ;;  %v67_v4 = vld [vmem:[#allocation5 + $0x8] sm:$0xff]  ;;  %v70_v5 = vld [vmem:[#allocation7] sm:$0xff]  ;;  %v64_v8 = vld [vmem:[#allocation2 + $0x10] sm:$0xff]  ;;  %v388_v18 = vunpack.c.l.s4 %v972_v17  ;;  %v1040_v19 = vshrl.u32 %v351_v16, 7  ;;  %s978_s10 = smov 32   ;;  %s979_s11 = smov 48  }
  0x28   :  { %809 = vmatprep.subr.mxu0 %v72_v1  ;;  %821 = vmatprep.subr.msk.mxu1 %vm74_vm0, %v67_v4  ;;  %v63_v6 = vld [vmem:[#allocation2 + $0x8] sm:$0xff]  ;;  %v65_v9 = vld [vmem:[#allocation2 + $0x18] sm:$0xff]  ;;  %v66_v10 = vld [vmem:[#allocation5] sm:$0xff]  ;;  %s980_s12 = smov 64   ;;  %s981_s13 = smov 96   ;;  %vm732_vm10 = vcmask 392192  }
  0x29   :  { %810 = vmatpush3.msra.mxu0 %v72_v1  ;;  %822 = vmatpush3.xpose.msk.msra.mxu1 %vm74_vm0, %v67_v4  ;;  %v68_v11 = vld [vmem:[#allocation5 + $0x10] sm:$0xff]  ;;  %v389_v20 = vunpack.c.0.s8 %v388_v18  ;;  %v789_v22 = vld.sshfl [vmem:[%s1104_s4] sm:$0x11 pattern:$0x75316420]  ;;  %v353_v26 = vsub.s32 0, %v1040_v19 }
  0x2a   :  { %811 = vmatprep.subr.mxu0 %v71_v3  ;;  %823 = vmatprep.subr.msk.mxu1 %vm74_vm0, %v66_v10  ;;  %v386_v24 = vcombine.high %v789_v22, %v789_v22  ;;  %v350_v48 = vld [vmem:[%s1103_s3] sm:$0x3]  ;;  %v364_v49 = vsub.s32 1, %v1040_v19  ;;  %s977_s3 = smov 16   ;;  %s982_s14 = smov 80   ;;  %vm734_vm11 = vcmask 523264  }
  0x2b   :  { %812 = vmatpush3.msra.mxu0 %v71_v3  ;;  %v392_v21 = vsub.s32 %v389_v20, %v1040_v19  ;;  %v354_v50 = vrot.slane %v350_v48, %v353_v26  ;;  %s983_s15 = smov 112   ;;  %vm736_vm12 = vcmask 654336   ;;  %vm738_vm13 = vcmask 785408   ;;  %s984_s16 = smov [#allocation8]  }
  0x2c   :  { %813 = vmatprep.subr.mxu0 %v70_v5  ;;  %v365_v51 = vrot.slane %v350_v48, %v364_v49  ;;  %vm740_vm14 = vcmask 916480   ;;  %s767_s17 = sshll.u32 %s984_s16, 4  ;;  %s768_s17 = int_to_ptr.vmem [resolvable:$true] %s767_s17 }
  0x2d   :  { %814 = vmatpush3.msra.mxu0 %v70_v5  ;;  %824 = vmatpush3.xpose.msk.msra.mxu1 %vm74_vm0, %v66_v10  ;;  %v393_v23 = vrot.slane %v789_v22, %v392_v21  ;;  %v400_v25 = vrot.slane %v386_v24, %v392_v21  ;;  %s941_s18 = scalar_lea.vmem %s768_s17, 64  ;;  %p946_p2 = scmp.lt.s32.totalorder %s768_s17, %s768_s17 }
  0x2e   :  { %816 = vmatmul.mubr.msk.f32.vlgmr.msra.gmra.mxu0 %vm74_vm0, %v63_v6  ;;  %828 = vmatprep.subr.msk.mxu0 %vm74_vm0, %v69_v7  ;;  %p942_p1 = scmp.ne.s32.totalorder %s768_s17, %s941_s18  ;;  %p947_p3 = scmp.lt.s32.totalorder %s941_s18, %s941_s18 }
  0x2f   :  { %818 = vmatprep.mubr.msk.f32.mxu0 %vm74_vm0, %v64_v8  ;;  %829 = vmatpush3.xpose.msk.msra.mxu0 %vm74_vm0, %v69_v7  ;;  %vm403_vm1 = vcmp.gt.f32.partialorder %v393_v23, 0.5  ;;  %vm404_vm2 = vcmp.gt.f32.partialorder %v400_v25, 0.5 }
  0x30   :  { %830 = vmatprep.subr.msk.mxu0 %vm74_vm0, %v68_v11  ;;  %v470_v28 = vsel %vm403_vm1, 1, %v973_v27  ;;  %v471_v31 = vsel %vm404_vm2, 1, %v973_v27  ;;  %p948_p4 = por %p947_p3, %p946_p2 }
  0x31   :  { %v475_v30 = vrot.slane %v470_v28, %v353_v26  ;;  %v479_v36 = vrot.slane %v471_v31, %v353_v26 }
  0x32   :  { %819 = vmatmul.mubr.msk.f32.gmra.mxu0 %vm74_vm0, %v65_v9  ;;  %p949_p5 = pnand %p948_p4, %p942_p1 }
  0x33   :  { %831 = vmatpush3.xpose.msk.msra.mxu0 %vm74_vm0, %v68_v11  ;;  %vm480_vm3 = vcmp.eq.s32.totalorder %v475_v30, 1  ;;  %vm481_vm5 = vcmp.eq.s32.totalorder %v479_v36, 1 }
  0xee   :  { %v817_v12 = vpop.f32.mrf.mxu0 }
  0xf0   :  { %v153_v13 = vpop.f32.mrf.mxu0 }
  0xf1   :  { %825 = vmatprep.mubr.msk.f32.mxu1 %vm74_vm0, %v153_v13 }
  0xf2   :  { %v820_v14 = vpop.f32.mrf.mxu0  ;;  %826 = vmatmul.mubr.msk.f32.vlgmr.msra.gmra.mxu1 %vm74_vm0, %v817_v12 }
  0xf4   :  { %v163_v15 = vpop.f32.mrf.mxu0 }
  0xf5   :  { %832 = vmatprep.mubr.msk.f32.mxu0 %vm74_vm0, %v163_v15 }
  0xf6   :  { %833 = vmatmul.mubr.msk.f32.vlgmr.msra.gmra.mxu0 %vm74_vm0, %v820_v14 }
 0x1b2   :  { %v827_v29 = vpop.f32.mrf.mxu1 }
 0x1b3   :  { %v1047_v33 = vmul.f32 0.3125, %v827_v29 }
 0x1b4   :  { %v250_v32 = vpop.f32.mrf.mxu1 }
 0x1b5   :  { %v1049_v34 = vmul.f32 0.3125, %v250_v32  ;;  %v483_v42 = vsel %vm480_vm3, %v1047_v33, -1e+30 }
 0x1b6   :  { %v834_v35 = vpop.f32.mrf.mxu0  ;;  %v489_v44 = vsel %vm417_vm4, %v483_v42, -inf }
 0x1b7   :  { %v482_v37 = vsel %vm480_vm3, %v1049_v34, -1e+30  ;;  %v349_v40 = vmul.f32 0.3125, %v834_v35 }
 0x1b8   :  { %v337_v38 = vpop.f32.mrf.mxu0  ;;  %v486_v39 = vsel %vm417_vm4, %v482_v37, -inf }
 0x1b9   :  { %v348_v41 = vmul.f32 0.3125, %v337_v38  ;;  %487 = vmax.xlane.f32.xlu0 %v486_v39  ;;  %v485_v46 = vsel %vm481_vm5, %v349_v40, -1e+30 }
 0x1ba   :  { %v495_v47 = vsel %vm417_vm4, %v485_v46, -inf }
 0x1bb   :  { %v484_v43 = vsel %vm481_vm5, %v348_v41, -1e+30 }
 0x1bc   :  { %v492_v45 = vsel %vm417_vm4, %v484_v43, -inf }
 0x1bd   :  { %490 = vmax.xlane.f32.xlu0 %v489_v44  ;;  %493 = vmax.xlane.f32.xlu1 %v492_v45 }
 0x1c1   :  { %496 = vmax.xlane.f32.xlu1 %v495_v47 }
 0x1d2   :  { %360 = vbcast.lane.b32.xlu1 %v354_v50, 264 }
 0x1d3   :  { %356 = vbcast.lane.b32.xlu0 %v354_v50, 256 }
 0x1d6   :  { %367 = vbcast.lane.b32.xlu1 %v365_v51, 256 }
 0x1da   :  { %371 = vbcast.lane.b32.xlu1 %v365_v51, 264 }
 0x242   :  { %v488_v52 = vpop.xlane.xlu0 %487 }
 0x243   :  { %v498_v53 = vsub.f32 %v482_v37, %v488_v52 }
 0x245   :  { %v502_v54 = vmul.f32 1.442695, %v498_v53 }
 0x246   :  { %v491_v55 = vpop.xlane.xlu0 %490  ;;  %v494_v56 = vpop.xlane.xlu1 %493 }
 0x247   :  { %853 = vpow2.f32 %v502_v54  ;;  %v499_v57 = vsub.f32 %v483_v42, %v491_v55  ;;  %v500_v58 = vsub.f32 %v484_v43, %v494_v56 }
 0x249   :  { %v504_v59 = vmul.f32 1.442695, %v499_v57  ;;  %v506_v60 = vmul.f32 1.442695, %v500_v58 }
 0x24a   :  { %v497_v61 = vpop.xlane.xlu1 %496  ;;  %v357_v10 = vpop.permute.xlu0 %356 }
 0x24b   :  { %855 = vpow2.f32 %v504_v59  ;;  %v501_v62 = vsub.f32 %v485_v46, %v497_v61  ;;  %vm373_vm7 = vcmp.gt.f32.partialorder %v357_v10, 0.5 }
 0x24c   :  { %857 = vpow2.f32 %v506_v60  ;;  %v413_v13 = vsel %vm373_vm7, %v1049_v34, -1e+30 }
 0x24d   :  { %v508_v63 = vmul.f32 1.442695, %v501_v62  ;;  %v418_v17 = vsel %vm417_vm4, %v413_v13, -inf }
 0x24e   :  { %v361_v8 = vpop.permute.xlu1 %360 }
 0x24f   :  { %859 = vpow2.f32 %v508_v63  ;;  %vm374_vm6 = vcmp.gt.f32.partialorder %v361_v8, 0.5 }
 0x250   :  { %v414_v12 = vsel %vm374_vm6, %v1047_v33, -1e+30 }
 0x251   :  { %v419_v15 = vsel %vm417_vm4, %v414_v12, -inf }
 0x252   :  { %v368_v9 = vpop.permute.xlu1 %367  ;;  %v420_v20 = vmax.f32 %v418_v17, %v419_v15 }
 0x253   :  { %vm375_vm9 = vcmp.gt.f32.partialorder %v368_v9, 0.5  ;;  %v974_v9 = vmov 1983009808  }
 0x254   :  { %v1061_v0 = vpop.eup %853  ;;  %v415_v16 = vsel %vm375_vm9, %v348_v41, -1e+30  ;;  %v421_v23 = vrot.slane %v420_v20, 4  ;;  %v544_v10 = vunpack.c.l.s4 %v974_v9 }
 0x255   :  { %v510_v1 = vsel %vm417_vm4, %v1061_v0, 0.0  ;;  %v427_v21 = vsel %vm417_vm4, %v415_v16, -inf }
 0x256   :  { %511 = vadd.xlane.f32.xlu0 %v510_v1  ;;  %v372_v11 = vpop.permute.xlu1 %371  ;;  %v422_v25 = vmax.f32 %v420_v20, %v421_v23 }
 0x257   :  { %vm376_vm8 = vcmp.gt.f32.partialorder %v372_v11, 0.5 }
 0x258   :  { %v1065_v2 = vpop.eup %855  ;;  %v416_v14 = vsel %vm376_vm8, %v349_v40, -1e+30  ;;  %v423_v27 = vrot.slane %v422_v25, 2 }
 0x259   :  { %v1067_v3 = vpop.eup %857  ;;  %v513_v4 = vsel %vm417_vm4, %v1065_v2, 0.0  ;;  %v428_v18 = vsel %vm417_vm4, %v416_v14, -inf }
 0x25a   :  { %514 = vadd.xlane.f32.xlu1 %v513_v4  ;;  %v516_v5 = vsel %vm417_vm4, %v1067_v3, 0.0  ;;  %v429_v22 = vmax.f32 %v427_v21, %v428_v18  ;;  %v424_v29 = vmax.f32 %v422_v25, %v423_v27 }
 0x25b   :  { %517 = vadd.xlane.f32.xlu0 %v516_v5 }
 0x25c   :  { %v1073_v6 = vpop.eup %859  ;;  %v430_v24 = vrot.slane %v429_v22, 4  ;;  %v425_v31 = vrot.slane %v424_v29, 1 }
 0x25d   :  { %v519_v7 = vsel %vm417_vm4, %v1073_v6, 0.0 }
 0x25e   :  { %v431_v26 = vmax.f32 %v429_v22, %v430_v24  ;;  %v426_v33 = vmax.f32 %v424_v29, %v425_v31 }
 0x25f   :  { %520 = vadd.xlane.f32.xlu0 %v519_v7 }
 0x260   :  { %v432_v28 = vrot.slane %v431_v26, 2  ;;  %v436_v35 = vsub.f32 %v413_v13, %v426_v33  ;;  %v437_v36 = vsub.f32 %v414_v12, %v426_v33  ;;  %v545_v13 = vunpack.c.0.s8 %v544_v10 }
 0x262   :  { %v433_v30 = vmax.f32 %v431_v26, %v432_v28  ;;  %v440_v39 = vmul.f32 1.442695, %v436_v35  ;;  %v442_v40 = vmul.f32 1.442695, %v437_v36  ;;  %v548_v22 = vsub.s32 %v545_v13, %v1040_v19 }
 0x263   :  { %v976_v36 = vmov 0.0  }
 0x264   :  { %v434_v32 = vrot.slane %v433_v30, 1  ;;  %861 = vpow2.f32 %v440_v39 }
 0x265   :  { %863 = vpow2.f32 %v442_v40 }
 0x266   :  { %v435_v34 = vmax.f32 %v433_v30, %v434_v32 }
 0x268   :  { %v438_v37 = vsub.f32 %v415_v16, %v435_v34  ;;  %v439_v38 = vsub.f32 %v416_v14, %v435_v34  ;;  %v975_v14 = vmov 1934713408  }
 0x269   :  { %v575_v15 = vunpack.c.l.s4 %v975_v14 }
 0x26a   :  { %v444_v41 = vmul.f32 1.442695, %v438_v37  ;;  %v446_v42 = vmul.f32 1.442695, %v439_v38 }
 0x26b   :  { %v576_v23 = vunpack.c.0.s8 %v575_v15 }
 0x26c   :  { %865 = vpow2.f32 %v444_v41 }
 0x26d   :  { %867 = vpow2.f32 %v446_v42  ;;  %v579_v31 = vsub.s32 %v576_v23, %v1040_v19 }
 0x271   :  { %v862_v43 = vpop.eup %861 }
 0x272   :  { %v864_v44 = vpop.eup %863  ;;  %v448_v47 = vsel %vm417_vm4, %v862_v43, 0.0 }
 0x273   :  { %v449_v48 = vsel %vm417_vm4, %v864_v44, 0.0 }
 0x274   :  { %v450_v51 = vadd.f32 %v449_v48, %v448_v47 }
 0x276   :  { %v451_v53 = vrot.slane %v450_v51, 4 }
 0x278   :  { %v452_v55 = vadd.f32 %v451_v53, %v450_v51 }
 0x279   :  { %v866_v45 = vpop.eup %865 }
 0x27a   :  { %v868_v46 = vpop.eup %867  ;;  %v457_v49 = vsel %vm417_vm4, %v866_v45, 0.0  ;;  %v453_v57 = vrot.slane %v452_v55, 2 }
 0x27b   :  { %v458_v50 = vsel %vm417_vm4, %v868_v46, 0.0 }
 0x27c   :  { %v459_v52 = vadd.f32 %v458_v50, %v457_v49  ;;  %v454_v59 = vadd.f32 %v453_v57, %v452_v55 }
 0x27e   :  { %v460_v54 = vrot.slane %v459_v52, 4  ;;  %v455_v61 = vrot.slane %v454_v59, 1 }
 0x280   :  { %v461_v56 = vadd.f32 %v460_v54, %v459_v52  ;;  %v456_v63 = vadd.f32 %v455_v61, %v454_v59 }
 0x282   :  { %v462_v58 = vrot.slane %v461_v56, 2 }
 0x284   :  { %v463_v60 = vadd.f32 %v462_v58, %v461_v56 }
 0x286   :  { %v464_v62 = vrot.slane %v463_v60, 1 }
 0x288   :  { %v465_v1 = vadd.f32 %v464_v62, %v463_v60 }
 0x2df   :  { %v512_v4 = vpop.xlane.xlu0 %511 }
 0x2e0   :  { %869 = vrcp.f32 %v512_v4 }
 0x2e1   :  { %871 = vrcp.f32 %v456_v63 }
 0x2e2   :  { %873 = vrcp.f32 %v465_v1 }
 0x2e3   :  { %v515_v5 = vpop.xlane.xlu1 %514 }
 0x2e4   :  { %v518_v7 = vpop.xlane.xlu0 %517  ;;  %875 = vrcp.f32 %v515_v5 }
 0x2e5   :  { %877 = vrcp.f32 %v518_v7 }
 0x2e8   :  { %v521_v8 = vpop.xlane.xlu0 %520 }
 0x2e9   :  { %879 = vrcp.f32 %v521_v8 }
 0x2ed   :  { %v870_v11 = vpop.eup %869 }
 0x2ee   :  { %v872_v12 = vpop.eup %871  ;;  %v534_v16 = vmul.f32 %v870_v11, %v1061_v0 }
 0x2ef   :  { %v874_v17 = vpop.eup %873  ;;  %v530_v20 = vmul.f32 %v872_v12, %v862_v43  ;;  %v531_v29 = vmul.f32 %v872_v12, %v864_v44 }
 0x2f0   :  { %v532_v24 = vmul.f32 %v874_v17, %v866_v45  ;;  %v533_v32 = vmul.f32 %v874_v17, %v868_v46 }
 0x2f1   :  { %v876_v18 = vpop.eup %875  ;;  %v538_v26 = vmul.f32 %v534_v16, %v530_v20 }
 0x2f2   :  { %v878_v21 = vpop.eup %877  ;;  %v535_v27 = vmul.f32 %v876_v18, %v1065_v2 }
 0x2f3   :  { %v536_v25 = vmul.f32 %v878_v21, %v1067_v3  ;;  %v549_v0 = vrot.slane %v538_v26, %v548_v22  ;;  %v542_v2 = vcombine.high %v538_v26, %v976_v36 }
 0x2f4   :  { %v539_v35 = vmul.f32 %v535_v27, %v531_v29 }
 0x2f5   :  { %v540_v28 = vmul.f32 %v536_v25, %v532_v24 }
 0x2f6   :  { %v880_v30 = vpop.eup %879  ;;  %v615_v41 = vrot.slane %v539_v35, %v548_v22  ;;  %v608_v55 = vcombine.high %v539_v35, %v976_v36 }
 0x2f7   :  { %v564_v33 = vrot.slane %v540_v28, %v548_v22  ;;  %v537_v34 = vmul.f32 %v880_v30, %v1073_v6  ;;  %v557_v37 = vcombine.high %v540_v28, %v976_v36  ;;  %v556_v6 = vrot.slane %v542_v2, %v548_v22 }
 0x2f8   :  { %v622_v58 = vrot.slane %v608_v55, %v548_v22 }
 0x2f9   :  { %v572_v38 = vcombine.low %v549_v0, %v564_v33  ;;  %v541_v39 = vmul.f32 %v537_v34, %v533_v32  ;;  %v573_v40 = vcombine.high %v549_v0, %v564_v33  ;;  %v571_v43 = vrot.slane %v557_v37, %v548_v22 }
 0x2fb   :  { %v580_v3 = vrot.slane %v572_v38, %v579_v31  ;;  %v630_v42 = vrot.slane %v541_v39, %v548_v22  ;;  %v587_v47 = vrot.slane %v573_v40, %v579_v31  ;;  %v588_v50 = vcombine.low %v556_v6, %v571_v43 }
 0x2fc   :  { %v623_v52 = vcombine.high %v541_v39, %v976_v36  ;;  %v589_v54 = vcombine.high %v556_v6, %v571_v43 }
 0x2fd   :  { %v604_v44 = vcombine.high %v580_v3, %v976_v36  ;;  %v639_v45 = vcombine.high %v615_v41, %v630_v42  ;;  %v638_v19 = vcombine.low %v615_v41, %v630_v42  ;;  %v605_v49 = vcombine.high %v587_v47, %v976_v36 }
 0x2fe   :  { %v596_v53 = vrot.slane %v588_v50, %v579_v31  ;;  %v637_v56 = vrot.slane %v623_v52, %v548_v22  ;;  %v603_v57 = vrot.slane %v589_v54, %v579_v31 }
 0x2ff   :  { %675 = vrot.lane.b32.xlu0 %v604_v44, %s977_s3  ;;  %v653_v46 = vrot.slane %v639_v45, %v579_v31  ;;  %v646_v48 = vrot.slane %v638_v19, %v579_v31 }
 0x300   :  { %v654_v60 = vcombine.low %v622_v58, %v637_v56  ;;  %v606_v61 = vcombine.high %v596_v53, %v976_v36  ;;  %v655_v63 = vcombine.high %v622_v58, %v637_v56  ;;  %v607_v1 = vcombine.high %v603_v57, %v976_v36 }
 0x301   :  { %707 = vrot.lane.b32.xlu1 %v653_v46, %s978_s10  ;;  %v670_v51 = vcombine.high %v646_v48, %v976_v36  ;;  %v671_v59 = vcombine.high %v653_v46, %v976_v36 }
 0x302   :  { %v662_v62 = vrot.slane %v654_v60, %v579_v31  ;;  %v669_v4 = vrot.slane %v655_v63, %v579_v31 }
 0x303   :  { %683 = vrot.lane.b32.xlu0 %v605_v49, %s979_s11 }
 0x304   :  { %v672_v5 = vcombine.high %v662_v62, %v976_v36  ;;  %v673_v7 = vcombine.high %v669_v4, %v976_v36 }
 0x305   :  { %703 = vrot.lane.b32.xlu1 %v670_v51, %s977_s3 }
 0x307   :  { %687 = vrot.lane.b32.xlu0 %v596_v53, %s980_s12 }
 0x309   :  { %679 = vrot.lane.b32.xlu1 %v587_v47, %s978_s10 }
 0x30b   :  { %695 = vrot.lane.b32.xlu0 %v603_v57, %s981_s13 }
 0x30d   :  { %711 = vrot.lane.b32.xlu1 %v671_v59, %s979_s11 }
 0x30f   :  { %691 = vrot.lane.b32.xlu0 %v606_v61, %s982_s14 }
 0x311   :  { %715 = vrot.lane.b32.xlu1 %v662_v62, %s980_s12 }
 0x313   :  { %699 = vrot.lane.b32.xlu0 %v607_v1, %s983_s15 }
 0x315   :  { %723 = vrot.lane.b32.xlu1 %v669_v4, %s981_s13 }
 0x319   :  { %719 = vrot.lane.b32.xlu1 %v672_v5, %s982_s14 }
 0x31d   :  { %727 = vrot.lane.b32.xlu1 %v673_v7, %s983_s15 }
 0x371   :  { %v676_v8 = vpop.permute.xlu0 %675 }
 0x372   :  { %v730_v17 = vsel %vm417_vm4, %v580_v3, %v676_v8 }
 0x373   :  { %v708_v9 = vpop.permute.xlu1 %707 }
 0x375   :  { %v684_v10 = vpop.permute.xlu0 %683 }
 0x377   :  { %v704_v11 = vpop.permute.xlu1 %703 }
 0x378   :  { %v742_v20 = vsel %vm417_vm4, %v646_v48, %v704_v11 }
 0x379   :  { %v688_v12 = vpop.permute.xlu0 %687  ;;  %v743_v24 = vsel %vm74_vm0, %v742_v20, %v708_v9 }
 0x37b   :  { %v680_v13 = vpop.permute.xlu1 %679 }
 0x37c   :  { %v731_v18 = vsel %vm74_vm0, %v730_v17, %v680_v13 }
 0x37d   :  { %v696_v15 = vpop.permute.xlu0 %695  ;;  %v733_v23 = vsel %vm732_vm10, %v731_v18, %v684_v10 }
 0x37e   :  { %v735_v26 = vsel %vm734_vm11, %v733_v23, %v688_v12 }
 0x37f   :  { %v712_v14 = vpop.permute.xlu1 %711 }
 0x380   :  { %v744_v25 = vsel %vm732_vm10, %v743_v24, %v712_v14 }
 0x381   :  { %v692_v21 = vpop.permute.xlu0 %691 }
 0x382   :  { %v737_v29 = vsel %vm736_vm12, %v735_v26, %v692_v21 }
 0x383   :  { %v716_v16 = vpop.permute.xlu1 %715  ;;  %v739_v32 = vsel %vm738_vm13, %v737_v29, %v696_v15 }
 0x384   :  { %v745_v27 = vsel %vm734_vm11, %v744_v25, %v716_v16 }
 0x385   :  { %v700_v31 = vpop.permute.xlu0 %699 }
 0x386   :  { %v741_v34 = vsel %vm740_vm14, %v739_v32, %v700_v31 }
 0x387   :  { %v724_v22 = vpop.permute.xlu1 %723 }
 0x38b   :  { %v720_v28 = vpop.permute.xlu1 %719 }
 0x38c   :  { %v746_v30 = vsel %vm736_vm12, %v745_v27, %v720_v28 }
 0x38d   :  { %v747_v0 = vsel %vm738_vm13, %v746_v30, %v724_v22 }
 0x38f   :  { %v728_v33 = vpop.permute.xlu1 %727 }
 0x390   :  { %v748_v35 = vsel %vm740_vm14, %v747_v0, %v728_v33 }
 0x391   :  { %v751_v36 = vcombine.low %v741_v34, %v748_v35 }
 0x393   :  { %790 = vst.sshfl [vmem:[#allocation8] sm:$0x33 pattern:$0x76325410] %v751_v36 }
 0x394   :  { %952 = shalt.err (!%p949_p5)
}
 0x395   :  { %770 = dma.vmem_to_hbm [thread:$0]  %s768_s17, 64, %s1105_s5, [#allocation4]  }
 0x396   :  { %965 = dma.done.wait [#allocation4], 64  }
 0x397   :  { %966 = vsyncadd [#allocation4], 4294967232 }
 0x398   :  { %774 = vsyncpa [#allocation3], 1 }
 0x399   :  { %775 = vsyncpa [#allocation6], 1 }
 0x39a   :  { %776 = vsyncpa [#allocation4], 1 }

</bundles_post_ra>
